<compile_context>
chip_gen: v5e
topology: v5e:2x2
jax: 0.10.0
libtpu: 0.0.40
codegen_flags: <defaults>
</compile_context>

<pallas_src>
import math

import numpy as np
import jax
import jax.numpy as jnp
from jax import lax
from jax.experimental import pallas as pl
from jax.experimental.pallas import tpu as pltpu

EPS = 1e-5

# Fixed Gaussian color model of the module (baked into the kernel as immediates).
GCM = ((0.06, 0.63, 0.27),
       (0.30, 0.04, -0.35),
       (0.34, -0.60, 0.17))


# --------------------- invariant definitions (pure jnp) ----------------------
# All small constants are tied to EPS (== the module's 1e-5) to avoid silent
# divergence.
def E_inv(E, Ex, Ey, El, Elx, Ely, Ell, Ellx, Elly):
    return Ex**2 + Ey**2 + Elx**2 + Ely**2 + Ellx**2 + Elly**2


def W_inv(E, Ex, Ey, El, Elx, Ely, Ell, Ellx, Elly):
    Wx = Ex / (E + EPS)
    Wlx = Elx / (E + EPS)
    Wllx = Ellx / (E + EPS)
    Wy = Ey / (E + EPS)
    Wly = Ely / (E + EPS)
    Wlly = Elly / (E + EPS)
    return Wx**2 + Wy**2 + Wlx**2 + Wly**2 + Wllx**2 + Wlly**2


def C_inv(E, Ex, Ey, El, Elx, Ely, Ell, Ellx, Elly):
    Clx = (Elx * E - El * Ex) / (E**2 + EPS)
    Cly = (Ely * E - El * Ey) / (E**2 + EPS)
    Cllx = (Ellx * E - Ell * Ex) / (E**2 + EPS)
    Clly = (Elly * E - Ell * Ey) / (E**2 + EPS)
    return Cllx**2 + Clly**2 + Clx**2 + Cly**2


def N_inv(E, Ex, Ey, El, Elx, Ely, Ell, Ellx, Elly):
    Nlx = (Elx * E - El * Ex) / (E**2 + EPS)
    Nly = (Ely * E - El * Ey) / (E**2 + EPS)
    Nllx = (Ellx * E**2 - Ell * Ex * E - 2 * Elx * El * E + 2 * El**2 * Ex) / (E**3 + EPS)
    Nlly = (Elly * E**2 - Ell * Ey * E - 2 * Ely * El * E + 2 * El**2 * Ey) / (E**3 + EPS)
    return Nlx**2 + Nly**2 + Nllx**2 + Nlly**2


def H_inv(E, Ex, Ey, El, Elx, Ely, Ell, Ellx, Elly):
    Hx = (Ell * Elx - El * Ellx) / (El**2 + Ell**2 + EPS)
    Hy = (Ell * Ely - El * Elly) / (El**2 + Ell**2 + EPS)
    return Hx**2 + Hy**2


INV_FUNCS = {'E': E_inv, 'W': W_inv, 'C': C_inv, 'N': N_inv, 'H': H_inv}


# ----------------- host-side (compile-time) filter construction --------------
def _gaussian_1d_kernels(scale, k=3):
    """1-D separable factors of the module's Gaussian basis filters.

    g    = outer(gn, gn)
    dgdx = outer(dn, gn)   (x[0] axis == image H axis)
    dgdy = outer(gn, dn)
    with gn = g1/sum(g1), dn = d1/sum(|d1|).
    """
    std = 2.0 ** scale
    fs = int(math.ceil(k * std + 0.5))
    x = np.arange(-fs, fs + 1, dtype=np.float64)
    g1 = np.exp(-(x / std) ** 2 / 2.0)
    d1 = -x / (std ** 3 * 2.0 * math.pi) * g1
    gn = g1 / g1.sum()
    dn = d1 / np.abs(d1).sum()
    return gn.astype(np.float32), dn.astype(np.float32)


def _band_matrix(k1d, n):
    """M[a, b] = k1d[b - a + P] if 0 <= b - a + P < K else 0.

    Y = M @ X  is the 'same' zero-padded cross-correlation of X's rows (H axis)
    with k1d;  X @ M.T  is the same thing along the columns (W axis).
    """
    K = int(k1d.shape[0])
    P = K // 2
    a = np.arange(n)
    diff = a[None, :] - a[:, None] + P           # (n, n): b - a + P
    valid = (diff >= 0) & (diff < K)
    return np.where(valid, k1d[np.clip(diff, 0, K - 1)], 0.0).astype(np.float32)


# ------------------------------ Pallas kernel ---------------------------------
def _make_kernel(invariant, B, H, W, mxu_dtype):
    inv_fn = INV_FUNCS[invariant]
    n_pix = float(H * W)
    BW = B * W

    def mdot(a, b):
        return jnp.dot(a.astype(mxu_dtype), b.astype(mxu_dtype),
                       preferred_element_type=jnp.float32)

    def kernel(cag_ref, cad_ref, rbg_ref, rbd_ref, x_ref, o_ref):
        # cag_ref/cad_ref: (H, H) column-conv band matrices (gn / dn)
        # rbg_ref/rbd_ref: (W, W) row-conv band matrices    (gn / dn)
        # x_ref          : (B, 3, H, W) block of images, NCHW
        # o_ref          : (1, H, B*W)  lane-dense output slab
        x = x_ref[...].astype(jnp.float32)
        x0 = x[:, 0].reshape(B * H, W)
        x1 = x[:, 1].reshape(B * H, W)
        x2 = x[:, 2].reshape(B * H, W)

        # Gaussian color model (compile-time immediates).
        m_e = GCM[0][0] * x0 + GCM[0][1] * x1 + GCM[0][2] * x2
        m_el = GCM[1][0] * x0 + GCM[1][1] * x1 + GCM[1][2] * x2
        m_ell = GCM[2][0] * x0 + GCM[2][1] * x1 + GCM[2][2] * x2

        # ---- row convs (along W): one channel/batch-stacked operand, 2 matmuls
        M_flat = jnp.concatenate([m_e, m_el, m_ell], axis=0)   # (3*B*H, W)
        RG = mdot(M_flat, rbg_ref[...])                         # gn along W
        RD = mdot(M_flat, rbd_ref[...])                         # dn along W

        # ---- relayout to lane-concatenated wide operands (H, 3*B*W),
        #      lane order (channel, batch, w)
        def to_wide(Y):
            pieces = []
            for c in range(3):
                for b in range(B):
                    r0 = (c * B + b) * H
                    pieces.append(Y[r0:r0 + H, :])
            return jnp.concatenate(pieces, axis=1)

        RGw = to_wide(RG)                                        # (H, 3*B*W)
        RDw = to_wide(RD)                                        # (H, 3*B*W)

        # ---- column convs (along H): 2 wide matmuls
        GOUT = mdot(cag_ref[...], jnp.concatenate([RGw, RDw], axis=1))  # (H, 6*B*W)
        DOUT = mdot(cad_ref[...], RGw)                                  # (H, 3*B*W)

        # plane slices, each (H, B*W)
        E = GOUT[:, 0 * BW:1 * BW]
        El = GOUT[:, 1 * BW:2 * BW]
        Ell = GOUT[:, 2 * BW:3 * BW]
        Ey = GOUT[:, 3 * BW:4 * BW]
        Ely = GOUT[:, 4 * BW:5 * BW]
        Elly = GOUT[:, 5 * BW:6 * BW]
        Ex = DOUT[:, 0 * BW:1 * BW]
        Elx = DOUT[:, 1 * BW:2 * BW]
        Ellx = DOUT[:, 2 * BW:3 * BW]

        inv = inv_fn(E, Ex, Ey, El, Elx, Ely, Ell, Ellx, Elly)
        logv = jnp.log(inv + EPS)                                # (H, B*W)

        # ---- per-image instance norm (single channel, no affine),
        #      two-pass (centered) statistics + rsqrt.
        means = [jnp.sum(logv[:, b * W:(b + 1) * W]) / n_pix for b in range(B)]
        mean_row = jnp.concatenate(
            [jnp.full((1, W), m, dtype=jnp.float32) for m in means], axis=1)
        d = logv - mean_row
        variances = [jnp.sum(jnp.square(d[:, b * W:(b + 1) * W])) / n_pix
                     for b in range(B)]
        istd_row = jnp.concatenate(
            [jnp.full((1, W), lax.rsqrt(v + EPS), dtype=jnp.float32)
             for v in variances], axis=1)

        o_ref[0] = d * istd_row

    return kernel


# -------------------------------- wrapper -------------------------------------
def _pick_block_batch(n, max_b=8):
    b = min(n, max_b)
    while b > 1 and n % b != 0:
        b -= 1
    return max(b, 1)


def ciconv2d(x, invariant='W', scale=0.0, k=3, mxu_dtype=jnp.float32,
             block_batch=None):
    # `scale` must be a concrete Python number: the filter size (and hence all
    # shapes below) depends on it, exactly as in the PyTorch module where it is
    # clamped in-place before use.
    scale = float(min(max(scale, -2.5), 2.5))
    N, C, H, Wd = x.shape
    assert C == 3, "CIConv2d expects 3 input channels"
    B = block_batch if block_batch is not None else _pick_block_batch(N)
    assert N % B == 0, "block batch must divide N"
    BW = B * Wd

    gn, dn = _gaussian_1d_kernels(scale, k)
    cag = jnp.asarray(_band_matrix(gn, H), dtype=mxu_dtype)      # column conv, gn
    cad = jnp.asarray(_band_matrix(dn, H), dtype=mxu_dtype)      # column conv, dn
    rbg = jnp.asarray(_band_matrix(gn, Wd).T, dtype=mxu_dtype)   # row conv, gn
    rbd = jnp.asarray(_band_matrix(dn, Wd).T, dtype=mxu_dtype)   # row conv, dn

    kernel = _make_kernel(invariant, B, H, Wd, mxu_dtype)

    out_wide = pl.pallas_call(
        kernel,
        out_shape=jax.ShapeDtypeStruct((N // B, H, BW), jnp.float32),
        grid=(N // B,),
        in_specs=[
            pl.BlockSpec((H, H), lambda n: (0, 0)),              # cag (resident)
            pl.BlockSpec((H, H), lambda n: (0, 0)),              # cad
            pl.BlockSpec((Wd, Wd), lambda n: (0, 0)),            # rbg
            pl.BlockSpec((Wd, Wd), lambda n: (0, 0)),            # rbd
            pl.BlockSpec((B, 3, H, Wd), lambda n: (n, 0, 0, 0)),  # image block
        ],
        out_specs=pl.BlockSpec((1, H, BW), lambda n: (n, 0, 0)),
        compiler_params=pltpu.CompilerParams(
            dimension_semantics=("parallel",),
            vmem_limit_bytes=32 * 1024 * 1024),
    )(cag, cad, rbg, rbd, x)

    # (N//B, H, B*W) -> (N, 1, H, W); pure layout plumbing done by XLA.
    out = (out_wide.reshape(N // B, H, B, Wd)
           .transpose(0, 2, 1, 3)
           .reshape(N, 1, H, Wd))
    return out


# --------------------------- pure-JAX reference -------------------------------
def gaussian_basis_filters(scale, k=3):
    """Replicates the PyTorch gaussian_basis_filters (2-D construction)."""
    std = 2.0 ** scale
    fs = int(math.ceil(k * std + 0.5))
    x = jnp.arange(-fs, fs + 1, dtype=jnp.float32)
    xx, yy = jnp.meshgrid(x, x, indexing='ij')
    g = jnp.exp(-((xx / std) ** 2) / 2) * jnp.exp(-((yy / std) ** 2) / 2)
    g = g / jnp.sum(g)
    dgdx = (-xx / (std**3 * 2 * math.pi)
            * jnp.exp(-((xx / std) ** 2) / 2) * jnp.exp(-((yy / std) ** 2) / 2))
    dgdx = dgdx / jnp.sum(jnp.abs(dgdx))
    dgdy = (-yy / (std**3 * 2 * math.pi)
            * jnp.exp(-((yy / std) ** 2) / 2) * jnp.exp(-((xx / std) ** 2) / 2))
    dgdy = dgdy / jnp.sum(jnp.abs(dgdy))
    return jnp.stack([g, dgdx, dgdy], axis=0)  # (3, K, K)


def ciconv2d_reference(x, invariant='W', scale=0.0, k=3):
    scale = float(min(max(scale, -2.5), 2.5))
    N, C, H, Wd = x.shape
    gcm = jnp.array(GCM, dtype=jnp.float32)
    w = gaussian_basis_filters(scale, k)
    K = int(w.shape[-1])
    P = K // 2

    b = jnp.einsum('ij,njp->nip', gcm,
                   x.astype(jnp.float32).reshape(N, C, H * Wd),
                   precision=lax.Precision.HIGHEST).reshape(N, 3, H, Wd)
    w4 = w[:, None, :, :]

    def conv(inp):
        return lax.conv_general_dilated(
            inp, w4, (1, 1), [(P, P), (P, P)],
            dimension_numbers=('NCHW', 'OIHW', 'NCHW'),
            precision=lax.Precision.HIGHEST)

    Eo, Elo, Ello = conv(b[:, 0:1]), conv(b[:, 1:2]), conv(b[:, 2:3])
    args = (Eo[:, 0:1], Eo[:, 1:2], Eo[:, 2:3],
            Elo[:, 0:1], Elo[:, 1:2], Elo[:, 2:3],
            Ello[:, 0:1], Ello[:, 1:2], Ello[:, 2:3])
    inv = INV_FUNCS[invariant](*args)
    logv = jnp.log(inv + EPS)
    m = logv.mean(axis=(2, 3), keepdims=True)
    v = ((logv - m) ** 2).mean(axis=(2, 3), keepdims=True)
    return (logv - m) / jnp.sqrt(v + EPS)


if __name__ == "__main__":
    key = jax.random.PRNGKey(0)
    # image-like input in [0, 1), NCHW with 3 color channels
    x = jax.random.uniform(key, (2, 3, 16, 16), dtype=jnp.float32)

    out = ciconv2d(x, invariant='W', scale=0.0)
    out = jax.block_until_ready(out)

    assert out.shape == (2, 1, 16, 16)
    assert bool(jnp.all(jnp.isfinite(out)))

    ref = ciconv2d_reference(x, invariant='W', scale=0.0)
    err = float(jnp.max(jnp.abs(out - ref)))
    assert err < 2e-2, f"mismatch vs reference: max abs err {err}"

    print("KERNEL_OK")
</pallas_src>

<mosaic_0001>
module attributes {stable_mosaic.version = 11 : i64} {
  func.func @kernel(%arg0: i32, %arg1: memref<16x16xf32, #tpu.memory_space<vmem>>, %arg2: memref<16x16xf32, #tpu.memory_space<vmem>>, %arg3: memref<16x16xf32, #tpu.memory_space<vmem>>, %arg4: memref<16x16xf32, #tpu.memory_space<vmem>>, %arg5: memref<2x3x16x16xf32, #tpu.memory_space<vmem>>, %arg6: memref<1x16x32xf32, #tpu.memory_space<vmem>>) attributes {dimension_semantics = [#tpu.dimension_semantics<parallel>], iteration_bounds = array<i64: 1>, scalar_prefetch = 0 : i64, scratch_operands = 0 : i64, tpu.core_type = #tpu.core_type<tc>, window_params = [{pipeline_mode = #tpu.pipeline_mode<synchronous>, transform_indices = @transform_0, window_bounds = array<i64: 16, 16>}, {pipeline_mode = #tpu.pipeline_mode<synchronous>, transform_indices = @transform_1, window_bounds = array<i64: 16, 16>}, {pipeline_mode = #tpu.pipeline_mode<synchronous>, transform_indices = @transform_2, window_bounds = array<i64: 16, 16>}, {pipeline_mode = #tpu.pipeline_mode<synchronous>, transform_indices = @transform_3, window_bounds = array<i64: 16, 16>}, {transform_indices = @transform_4, window_bounds = array<i64: 2, 3, 16, 16>}, {transform_indices = @transform_5, window_bounds = array<i64: 1, 16, 32>}]} {
    %c0 = arith.constant 0 : index
    %c0_0 = arith.constant 0 : index
    %c0_1 = arith.constant 0 : index
    %c0_2 = arith.constant 0 : index
    %0 = vector.load %arg5[%c0, %c0_0, %c0_1, %c0_2] : memref<2x3x16x16xf32, #tpu.memory_space<vmem>>, vector<2x3x16x16xf32>
    %1 = vector.extract_strided_slice %0 {offsets = [0, 0, 0, 0], sizes = [2, 1, 16, 16], strides = [1, 1, 1, 1]} : vector<2x3x16x16xf32> to vector<2x1x16x16xf32>
    %2 = vector.shape_cast %1 : vector<2x1x16x16xf32> to vector<2x16x16xf32>
    %3 = vector.shape_cast %2 : vector<2x16x16xf32> to vector<32x16xf32>
    %4 = vector.extract_strided_slice %0 {offsets = [0, 1, 0, 0], sizes = [2, 1, 16, 16], strides = [1, 1, 1, 1]} : vector<2x3x16x16xf32> to vector<2x1x16x16xf32>
    %5 = vector.shape_cast %4 : vector<2x1x16x16xf32> to vector<2x16x16xf32>
    %6 = vector.shape_cast %5 : vector<2x16x16xf32> to vector<32x16xf32>
    %7 = vector.extract_strided_slice %0 {offsets = [0, 2, 0, 0], sizes = [2, 1, 16, 16], strides = [1, 1, 1, 1]} : vector<2x3x16x16xf32> to vector<2x1x16x16xf32>
    %8 = vector.shape_cast %7 : vector<2x1x16x16xf32> to vector<2x16x16xf32>
    %9 = vector.shape_cast %8 : vector<2x16x16xf32> to vector<32x16xf32>
    %cst = arith.constant 6.000000e-02 : f32
    %10 = vector.broadcast %cst : f32 to vector<32x16xf32>
    %11 = arith.mulf %10, %3 : vector<32x16xf32>
    %cst_3 = arith.constant 6.300000e-01 : f32
    %12 = vector.broadcast %cst_3 : f32 to vector<32x16xf32>
    %13 = arith.mulf %12, %6 : vector<32x16xf32>
    %14 = arith.addf %11, %13 : vector<32x16xf32>
    %cst_4 = arith.constant 2.700000e-01 : f32
    %15 = vector.broadcast %cst_4 : f32 to vector<32x16xf32>
    %16 = arith.mulf %15, %9 : vector<32x16xf32>
    %17 = arith.addf %14, %16 : vector<32x16xf32>
    %cst_5 = arith.constant 3.000000e-01 : f32
    %18 = vector.broadcast %cst_5 : f32 to vector<32x16xf32>
    %19 = arith.mulf %18, %3 : vector<32x16xf32>
    %cst_6 = arith.constant 4.000000e-02 : f32
    %20 = vector.broadcast %cst_6 : f32 to vector<32x16xf32>
    %21 = arith.mulf %20, %6 : vector<32x16xf32>
    %22 = arith.addf %19, %21 : vector<32x16xf32>
    %cst_7 = arith.constant -3.500000e-01 : f32
    %23 = vector.broadcast %cst_7 : f32 to vector<32x16xf32>
    %24 = arith.mulf %23, %9 : vector<32x16xf32>
    %25 = arith.addf %22, %24 : vector<32x16xf32>
    %cst_8 = arith.constant 3.400000e-01 : f32
    %26 = vector.broadcast %cst_8 : f32 to vector<32x16xf32>
    %27 = arith.mulf %26, %3 : vector<32x16xf32>
    %cst_9 = arith.constant -6.000000e-01 : f32
    %28 = vector.broadcast %cst_9 : f32 to vector<32x16xf32>
    %29 = arith.mulf %28, %6 : vector<32x16xf32>
    %30 = arith.addf %27, %29 : vector<32x16xf32>
    %cst_10 = arith.constant 1.700000e-01 : f32
    %31 = vector.broadcast %cst_10 : f32 to vector<32x16xf32>
    %32 = arith.mulf %31, %9 : vector<32x16xf32>
    %33 = arith.addf %30, %32 : vector<32x16xf32>
    %34 = tpu.concatenate %17, %25, %33 in 0 : vector<32x16xf32>, vector<32x16xf32>, vector<32x16xf32> -> vector<96x16xf32>
    %c0_11 = arith.constant 0 : index
    %c0_12 = arith.constant 0 : index
    %35 = vector.load %arg3[%c0_11, %c0_12] : memref<16x16xf32, #tpu.memory_space<vmem>>, vector<16x16xf32>
    %cst_13 = arith.constant dense<0.000000e+00> : vector<96x16xf32>
    %36 = tpu.matmul %34, %35, %cst_13 {dimension_numbers = #tpu.dot_dimension_numbers<[1], [0], [0], [1], [0, 0, 1, 1], [], []>} : vector<96x16xf32>, vector<16x16xf32>, vector<96x16xf32> -> vector<96x16xf32>
    %c0_14 = arith.constant 0 : index
    %c0_15 = arith.constant 0 : index
    %37 = vector.load %arg4[%c0_14, %c0_15] : memref<16x16xf32, #tpu.memory_space<vmem>>, vector<16x16xf32>
    %cst_16 = arith.constant dense<0.000000e+00> : vector<96x16xf32>
    %38 = tpu.matmul %34, %37, %cst_16 {dimension_numbers = #tpu.dot_dimension_numbers<[1], [0], [0], [1], [0, 0, 1, 1], [], []>} : vector<96x16xf32>, vector<16x16xf32>, vector<96x16xf32> -> vector<96x16xf32>
    %39 = vector.extract_strided_slice %36 {offsets = [0, 0], sizes = [16, 16], strides = [1, 1]} : vector<96x16xf32> to vector<16x16xf32>
    %40 = vector.extract_strided_slice %36 {offsets = [16, 0], sizes = [16, 16], strides = [1, 1]} : vector<96x16xf32> to vector<16x16xf32>
    %41 = vector.extract_strided_slice %36 {offsets = [32, 0], sizes = [16, 16], strides = [1, 1]} : vector<96x16xf32> to vector<16x16xf32>
    %42 = vector.extract_strided_slice %36 {offsets = [48, 0], sizes = [16, 16], strides = [1, 1]} : vector<96x16xf32> to vector<16x16xf32>
    %43 = vector.extract_strided_slice %36 {offsets = [64, 0], sizes = [16, 16], strides = [1, 1]} : vector<96x16xf32> to vector<16x16xf32>
    %44 = vector.extract_strided_slice %36 {offsets = [80, 0], sizes = [16, 16], strides = [1, 1]} : vector<96x16xf32> to vector<16x16xf32>
    %45 = tpu.concatenate %39, %40, %41, %42, %43, %44 in 1 : vector<16x16xf32>, vector<16x16xf32>, vector<16x16xf32>, vector<16x16xf32>, vector<16x16xf32>, vector<16x16xf32> -> vector<16x96xf32>
    %46 = vector.extract_strided_slice %38 {offsets = [0, 0], sizes = [16, 16], strides = [1, 1]} : vector<96x16xf32> to vector<16x16xf32>
    %47 = vector.extract_strided_slice %38 {offsets = [16, 0], sizes = [16, 16], strides = [1, 1]} : vector<96x16xf32> to vector<16x16xf32>
    %48 = vector.extract_strided_slice %38 {offsets = [32, 0], sizes = [16, 16], strides = [1, 1]} : vector<96x16xf32> to vector<16x16xf32>
    %49 = vector.extract_strided_slice %38 {offsets = [48, 0], sizes = [16, 16], strides = [1, 1]} : vector<96x16xf32> to vector<16x16xf32>
    %50 = vector.extract_strided_slice %38 {offsets = [64, 0], sizes = [16, 16], strides = [1, 1]} : vector<96x16xf32> to vector<16x16xf32>
    %51 = vector.extract_strided_slice %38 {offsets = [80, 0], sizes = [16, 16], strides = [1, 1]} : vector<96x16xf32> to vector<16x16xf32>
    %52 = tpu.concatenate %46, %47, %48, %49, %50, %51 in 1 : vector<16x16xf32>, vector<16x16xf32>, vector<16x16xf32>, vector<16x16xf32>, vector<16x16xf32>, vector<16x16xf32> -> vector<16x96xf32>
    %c0_17 = arith.constant 0 : index
    %c0_18 = arith.constant 0 : index
    %53 = vector.load %arg1[%c0_17, %c0_18] : memref<16x16xf32, #tpu.memory_space<vmem>>, vector<16x16xf32>
    %54 = tpu.concatenate %45, %52 in 1 : vector<16x96xf32>, vector<16x96xf32> -> vector<16x192xf32>
    %cst_19 = arith.constant dense<0.000000e+00> : vector<16x192xf32>
    %55 = tpu.matmul %53, %54, %cst_19 {dimension_numbers = #tpu.dot_dimension_numbers<[1], [0], [0], [1], [0, 0, 1, 1], [], []>} : vector<16x16xf32>, vector<16x192xf32>, vector<16x192xf32> -> vector<16x192xf32>
    %c0_20 = arith.constant 0 : index
    %c0_21 = arith.constant 0 : index
    %56 = vector.load %arg2[%c0_20, %c0_21] : memref<16x16xf32, #tpu.memory_space<vmem>>, vector<16x16xf32>
    %cst_22 = arith.constant dense<0.000000e+00> : vector<16x96xf32>
    %57 = tpu.matmul %56, %45, %cst_22 {dimension_numbers = #tpu.dot_dimension_numbers<[1], [0], [0], [1], [0, 0, 1, 1], [], []>} : vector<16x16xf32>, vector<16x96xf32>, vector<16x96xf32> -> vector<16x96xf32>
    %58 = vector.extract_strided_slice %55 {offsets = [0, 0], sizes = [16, 32], strides = [1, 1]} : vector<16x192xf32> to vector<16x32xf32>
    %59 = vector.extract_strided_slice %55 {offsets = [0, 96], sizes = [16, 32], strides = [1, 1]} : vector<16x192xf32> to vector<16x32xf32>
    %60 = vector.extract_strided_slice %55 {offsets = [0, 128], sizes = [16, 32], strides = [1, 1]} : vector<16x192xf32> to vector<16x32xf32>
    %61 = vector.extract_strided_slice %55 {offsets = [0, 160], sizes = [16, 32], strides = [1, 1]} : vector<16x192xf32> to vector<16x32xf32>
    %62 = vector.extract_strided_slice %57 {offsets = [0, 0], sizes = [16, 32], strides = [1, 1]} : vector<16x96xf32> to vector<16x32xf32>
    %63 = vector.extract_strided_slice %57 {offsets = [0, 32], sizes = [16, 32], strides = [1, 1]} : vector<16x96xf32> to vector<16x32xf32>
    %64 = vector.extract_strided_slice %57 {offsets = [0, 64], sizes = [16, 32], strides = [1, 1]} : vector<16x96xf32> to vector<16x32xf32>
    %cst_23 = arith.constant 9.99999974E-6 : f32
    %65 = vector.broadcast %cst_23 : f32 to vector<16x32xf32>
    %66 = arith.addf %58, %65 : vector<16x32xf32>
    %67 = arith.divf %62, %66 : vector<16x32xf32>
    %cst_24 = arith.constant 9.99999974E-6 : f32
    %68 = vector.broadcast %cst_24 : f32 to vector<16x32xf32>
    %69 = arith.addf %58, %68 : vector<16x32xf32>
    %70 = arith.divf %63, %69 : vector<16x32xf32>
    %cst_25 = arith.constant 9.99999974E-6 : f32
    %71 = vector.broadcast %cst_25 : f32 to vector<16x32xf32>
    %72 = arith.addf %58, %71 : vector<16x32xf32>
    %73 = arith.divf %64, %72 : vector<16x32xf32>
    %cst_26 = arith.constant 9.99999974E-6 : f32
    %74 = vector.broadcast %cst_26 : f32 to vector<16x32xf32>
    %75 = arith.addf %58, %74 : vector<16x32xf32>
    %76 = arith.divf %59, %75 : vector<16x32xf32>
    %cst_27 = arith.constant 9.99999974E-6 : f32
    %77 = vector.broadcast %cst_27 : f32 to vector<16x32xf32>
    %78 = arith.addf %58, %77 : vector<16x32xf32>
    %79 = arith.divf %60, %78 : vector<16x32xf32>
    %cst_28 = arith.constant 9.99999974E-6 : f32
    %80 = vector.broadcast %cst_28 : f32 to vector<16x32xf32>
    %81 = arith.addf %58, %80 : vector<16x32xf32>
    %82 = arith.divf %61, %81 : vector<16x32xf32>
    %83 = arith.mulf %67, %67 : vector<16x32xf32>
    %84 = arith.mulf %76, %76 : vector<16x32xf32>
    %85 = arith.addf %83, %84 : vector<16x32xf32>
    %86 = arith.mulf %70, %70 : vector<16x32xf32>
    %87 = arith.addf %85, %86 : vector<16x32xf32>
    %88 = arith.mulf %79, %79 : vector<16x32xf32>
    %89 = arith.addf %87, %88 : vector<16x32xf32>
    %90 = arith.mulf %73, %73 : vector<16x32xf32>
    %91 = arith.addf %89, %90 : vector<16x32xf32>
    %92 = arith.mulf %82, %82 : vector<16x32xf32>
    %93 = arith.addf %91, %92 : vector<16x32xf32>
    %cst_29 = arith.constant 9.99999974E-6 : f32
    %94 = vector.broadcast %cst_29 : f32 to vector<16x32xf32>
    %95 = arith.addf %93, %94 : vector<16x32xf32>
    %96 = math.log %95 : vector<16x32xf32>
    %97 = vector.extract_strided_slice %96 {offsets = [0, 0], sizes = [16, 16], strides = [1, 1]} : vector<16x32xf32> to vector<16x16xf32>
    %98 = vector.shape_cast %97 : vector<16x16xf32> to vector<1x16x16xf32>
    %cst_30 = arith.constant dense<0.000000e+00> : vector<1xf32>
    %99 = vector.multi_reduction <add>, %98, %cst_30 [1, 2] : vector<1x16x16xf32> to vector<1xf32>
    %100 = vector.shape_cast %99 : vector<1xf32> to vector<1x1x1xf32>
    %101 = vector.extract %100[0, 0, 0] : f32 from vector<1x1x1xf32>
    %cst_31 = arith.constant 2.560000e+02 : f32
    %102 = arith.divf %101, %cst_31 : f32
    %103 = vector.extract_strided_slice %96 {offsets = [0, 16], sizes = [16, 16], strides = [1, 1]} : vector<16x32xf32> to vector<16x16xf32>
    %104 = vector.shape_cast %103 : vector<16x16xf32> to vector<1x16x16xf32>
    %cst_32 = arith.constant dense<0.000000e+00> : vector<1xf32>
    %105 = vector.multi_reduction <add>, %104, %cst_32 [1, 2] : vector<1x16x16xf32> to vector<1xf32>
    %106 = vector.shape_cast %105 : vector<1xf32> to vector<1x1x1xf32>
    %107 = vector.extract %106[0, 0, 0] : f32 from vector<1x1x1xf32>
    %cst_33 = arith.constant 2.560000e+02 : f32
    %108 = arith.divf %107, %cst_33 : f32
    %109 = vector.broadcast %102 : f32 to vector<1x16xf32>
    %110 = vector.broadcast %108 : f32 to vector<1x16xf32>
    %111 = tpu.concatenate %109, %110 in 1 : vector<1x16xf32>, vector<1x16xf32> -> vector<1x32xf32>
    %112 = vector.broadcast %111 : vector<1x32xf32> to vector<16x32xf32>
    %113 = arith.subf %96, %112 : vector<16x32xf32>
    %114 = vector.extract_strided_slice %113 {offsets = [0, 0], sizes = [16, 16], strides = [1, 1]} : vector<16x32xf32> to vector<16x16xf32>
    %115 = arith.mulf %114, %114 : vector<16x16xf32>
    %116 = vector.shape_cast %115 : vector<16x16xf32> to vector<1x16x16xf32>
    %cst_34 = arith.constant dense<0.000000e+00> : vector<1xf32>
    %117 = vector.multi_reduction <add>, %116, %cst_34 [1, 2] : vector<1x16x16xf32> to vector<1xf32>
    %118 = vector.shape_cast %117 : vector<1xf32> to vector<1x1x1xf32>
    %119 = vector.extract %118[0, 0, 0] : f32 from vector<1x1x1xf32>
    %cst_35 = arith.constant 2.560000e+02 : f32
    %120 = arith.divf %119, %cst_35 : f32
    %121 = vector.extract_strided_slice %113 {offsets = [0, 16], sizes = [16, 16], strides = [1, 1]} : vector<16x32xf32> to vector<16x16xf32>
    %122 = arith.mulf %121, %121 : vector<16x16xf32>
    %123 = vector.shape_cast %122 : vector<16x16xf32> to vector<1x16x16xf32>
    %cst_36 = arith.constant dense<0.000000e+00> : vector<1xf32>
    %124 = vector.multi_reduction <add>, %123, %cst_36 [1, 2] : vector<1x16x16xf32> to vector<1xf32>
    %125 = vector.shape_cast %124 : vector<1xf32> to vector<1x1x1xf32>
    %126 = vector.extract %125[0, 0, 0] : f32 from vector<1x1x1xf32>
    %cst_37 = arith.constant 2.560000e+02 : f32
    %127 = arith.divf %126, %cst_37 : f32
    %cst_38 = arith.constant 9.99999974E-6 : f32
    %128 = arith.addf %120, %cst_38 : f32
    %129 = math.rsqrt %128 : f32
    %130 = vector.broadcast %129 : f32 to vector<1x16xf32>
    %cst_39 = arith.constant 9.99999974E-6 : f32
    %131 = arith.addf %127, %cst_39 : f32
    %132 = math.rsqrt %131 : f32
    %133 = vector.broadcast %132 : f32 to vector<1x16xf32>
    %134 = tpu.concatenate %130, %133 in 1 : vector<1x16xf32>, vector<1x16xf32> -> vector<1x32xf32>
    %135 = vector.broadcast %134 : vector<1x32xf32> to vector<16x32xf32>
    %136 = arith.mulf %113, %135 : vector<16x32xf32>
    %c0_40 = arith.constant 0 : index
    %c0_41 = arith.constant 0 : index
    %c0_42 = arith.constant 0 : index
    %137 = vector.load %arg6[%c0_40, %c0_41, %c0_42] : memref<1x16x32xf32, #tpu.memory_space<vmem>>, vector<1x16x32xf32>
    %138 = vector.shape_cast %137 : vector<1x16x32xf32> to vector<16x32xf32>
    %139 = vector.shape_cast %136 : vector<16x32xf32> to vector<1x16x32xf32>
    tpu.vector_store %arg6[%c0_40, %c0_41, %c0_42], %139 {strides = array<i32>} : memref<1x16x32xf32, #tpu.memory_space<vmem>>, vector<1x16x32xf32>,
    return
  }
  func.func @transform_0(%arg0: i32) -> (i32, i32) {
    %c0_i32 = arith.constant 0 : i32
    %c0_i32_0 = arith.constant 0 : i32
    %c0_i32_1 = arith.constant 0 : i32
    return %c0_i32, %c0_i32_0 : i32, i32
  }
  func.func @transform_1(%arg0: i32) -> (i32, i32) {
    %c0_i32 = arith.constant 0 : i32
    %c0_i32_0 = arith.constant 0 : i32
    %c0_i32_1 = arith.constant 0 : i32
    return %c0_i32, %c0_i32_0 : i32, i32
  }
  func.func @transform_2(%arg0: i32) -> (i32, i32) {
    %c0_i32 = arith.constant 0 : i32
    %c0_i32_0 = arith.constant 0 : i32
    %c0_i32_1 = arith.constant 0 : i32
    return %c0_i32, %c0_i32_0 : i32, i32
  }
  func.func @transform_3(%arg0: i32) -> (i32, i32) {
    %c0_i32 = arith.constant 0 : i32
    %c0_i32_0 = arith.constant 0 : i32
    %c0_i32_1 = arith.constant 0 : i32
    return %c0_i32, %c0_i32_0 : i32, i32
  }
  func.func @transform_4(%arg0: i32) -> (i32, i32, i32, i32) {
    %c0_i32 = arith.constant 0 : i32
    %c0_i32_0 = arith.constant 0 : i32
    %c0_i32_1 = arith.constant 0 : i32
    %c0_i32_2 = arith.constant 0 : i32
    return %arg0, %c0_i32, %c0_i32_0, %c0_i32_1 : i32, i32, i32, i32
  }
  func.func @transform_5(%arg0: i32) -> (i32, i32, i32) {
    %c0_i32 = arith.constant 0 : i32
    %c0_i32_0 = arith.constant 0 : i32
    %c0_i32_1 = arith.constant 0 : i32
    return %arg0, %c0_i32, %c0_i32_0 : i32, i32, i32
  }
}

</mosaic_0001>

<bundles_post_ra>
// kernel: tpu_custom_call.1
= control target key start
LH: loop header
LB: loop body
LE: loop exit
PB: predicated region body
PF: predicated region fallthrough
CT: control target
= control target key end

     0   :  { %10 = vsyncpa [#allocation3], 0  ;;  %s1455_s0 = inlined_call_operand.hbm [shape: f32[16,16], index: 0, kind: input, shape index: {}]   ;;  %s1456_s1 = inlined_call_operand.hbm [shape: f32[16,16], index: 1, kind: input, shape index: {}]   ;;  %s1457_s2 = inlined_call_operand.hbm [shape: f32[16,16], index: 2, kind: input, shape index: {}]   ;;  %s1458_s3 = inlined_call_operand.hbm [shape: f32[16,16], index: 3, kind: input, shape index: {}]   ;;  %s1459_s4 = inlined_call_operand.hbm [shape: f32[2,3,16,16], index: 4, kind: input, shape index: {}]   ;;  %s1460_s5 = inlined_call_operand.hbm [shape: f32[1,16,32], index: 5, kind: output, shape index: {}]  }
   0x1   :  { %11 = vsyncpa [#allocation6], 0 }
   0x2   :  { %12 = vsyncpa [#allocation9], 0 }
   0x3   :  { %13 = vsyncpa [#allocation4], 0  ;;  %s31_s20 = sshll.u32 %s1456_s1, 4  ;;  %s1184_s21 = smov [#allocation5]   ;;  %s32_s20 = int_to_ptr.hbm [resolvable:$true] %s31_s20 }
   0x4   :  { %s33_s22 = sshll.u32 %s1184_s21, 4  ;;  %s57_s25 = sshll.u32 %s1458_s3, 4  ;;  %s34_s22 = int_to_ptr.vmem [resolvable:$true] %s33_s22  ;;  %s58_s25 = int_to_ptr.hbm [resolvable:$true] %s57_s25 }
   0x5   :  { %s1185_s26 = smov 128   ;;  %s1186_s27 = smov 8  }
   0x6   :  { %39 = dma.hbm_to_vmem [thread:$0]  %s32_s20, 256, %s34_s22, [#allocation6], %s1185_s26, %s1185_s26, %s1186_s27  }
   0x7   :  { %s1187_s28 = smov [#allocation8]   ;;  %s18_s1 = sshll.u32 %s1455_s0, 4  ;;  %s19_s1 = int_to_ptr.hbm [resolvable:$true] %s18_s1 }
   0x8   :  { %s59_s29 = sshll.u32 %s1187_s28, 4  ;;  %s44_s8 = sshll.u32 %s1457_s2, 4  ;;  %s60_s29 = int_to_ptr.vmem [resolvable:$true] %s59_s29  ;;  %s45_s8 = int_to_ptr.hbm [resolvable:$true] %s44_s8 }
   0x9   :  { %65 = dma.hbm_to_vmem [thread:$0]  %s58_s25, 256, %s60_s29, [#allocation9], %s1185_s26, %s1185_s26, %s1186_s27  }
   0xa   :  { %s1188_s9 = smov [#allocation2]   ;;  %s1189_s11 = smov [#allocation7]  }
   0xb   :  { %s20_s10 = sshll.u32 %s1188_s9, 4  ;;  %s46_s0 = sshll.u32 %s1189_s11, 4  ;;  %s21_s10 = int_to_ptr.vmem [resolvable:$true] %s20_s10  ;;  %s47_s0 = int_to_ptr.vmem [resolvable:$true] %s46_s0 }
   0xc   :  { %26 = dma.hbm_to_vmem [thread:$0]  %s19_s1, 256, %s21_s10, [#allocation3], %s1185_s26, %s1185_s26, %s1186_s27  }
   0xd   :  { %s70_s14 = sshll.u32 %s1459_s4, 4  ;;  %s1190_s2 = smov [#allocation10]   ;;  %s71_s14 = int_to_ptr.hbm [resolvable:$true] %s70_s14 }
   0xe   :  { %52 = dma.hbm_to_vmem [thread:$0]  %s45_s8, 256, %s47_s0, [#allocation6], %s1185_s26, %s1185_s26, %s1186_s27  }
   0xf   :  { %s72_s15 = sshll.u32 %s1190_s2, 4  ;;  %s73_s15 = int_to_ptr.vmem [resolvable:$true] %s72_s15 }
  0x10   :  { %78 = dma.hbm_to_vmem [thread:$0]  %s71_s14, 1536, %s73_s15, [#allocation9], %s1185_s26, %s1185_s26, %s1186_s27  }
  0x11   :  { %1176 = dma.done.wait [#allocation3], 256  }
  0x12   :  { %1177 = vsyncadd [#allocation3], 4294967040 }
  0x13   :  { %1178 = dma.done.wait [#allocation6], 512  }
  0x14   :  { %1179 = vsyncadd [#allocation6], 4294966784 }
  0x15   :  { %1180 = dma.done.wait [#allocation9], 1792  }
  0x16   :  { %1181 = vsyncadd [#allocation9], 4294965504  ;;  %v264_v0 = vld [vmem:[#allocation8 + $0x8] sm:$0xff]  ;;  %v263_v1 = vld [vmem:[#allocation8] sm:$0xff]  ;;  %vm173_vm0 = vcmask 130048   ;;  %s1191_s4 = smov 16  }
  0x17   :  { %v1260_v2 = vld [vmem:[#allocation10] sm:$0xff]  ;;  %279 = vmatpush.msra.mxu1 %v264_v0  ;;  %919 = vmatpush.msra.mxu2 %v264_v0  ;;  %v1262_v3 = vld [vmem:[#allocation10 + $0x10] sm:$0xff]  ;;  %v172_v11 = vld [vmem:[#allocation7 + $0x8] sm:$0xff]  ;;  %s1192_s16 = smov 80   ;;  %s1193_s17 = smov 32   ;;  %vm360_vm1 = vcmask 261120  }
  0x18   :  { %v1264_v4 = vld [vmem:[#allocation10 + $0x20] sm:$0xff]  ;;  %v111_v5 = vmul.f32 0.06, %v1260_v2  ;;  %v151_v6 = vmul.f32 0.34, %v1260_v2  ;;  %v1272_v13 = vld [vmem:[#allocation10 + $0x8] sm:$0xff]  ;;  %224 = vmatpush.msra.mxu0 %v172_v11  ;;  %917 = vmatpush.msra.mxu3 %v172_v11 }
  0x19   :  { %v115_v7 = vmul.f32 0.63, %v1262_v3  ;;  %v123_v8 = vmul.f32 0.27, %v1264_v4  ;;  %v155_v9 = vmul.f32 -0.6, %v1262_v3  ;;  %280 = vmatpush.msra.mxu1 %v263_v1  ;;  %920 = vmatpush.msra.mxu2 %v263_v1 }
  0x1a   :  { %v163_v10 = vmul.f32 0.17, %v1264_v4  ;;  %v171_v12 = vld [vmem:[#allocation7] sm:$0xff]  ;;  %v1274_v16 = vld [vmem:[#allocation10 + $0x18] sm:$0xff]  ;;  %v112_v17 = vmul.f32 0.06, %v1272_v13 }
  0x1b   :  { %v119_v14 = vadd.f32 %v115_v7, %v111_v5  ;;  %v159_v15 = vadd.f32 %v155_v9, %v151_v6  ;;  %v152_v18 = vmul.f32 0.34, %v1272_v13  ;;  %v1278_v19 = vld [vmem:[#allocation10 + $0x28] sm:$0xff]  ;;  %v116_v20 = vmul.f32 0.63, %v1274_v16  ;;  %225 = vmatpush.msra.mxu0 %v171_v12  ;;  %918 = vmatpush.msra.mxu3 %v171_v12  ;;  %v105_v28 = vld [vmem:[#allocation10 + $0x30] sm:$0xff] }
  0x1c   :  { %v156_v21 = vmul.f32 -0.6, %v1274_v16  ;;  %v124_v25 = vmul.f32 0.27, %v1278_v19  ;;  %v164_v27 = vmul.f32 0.17, %v1278_v19 }
  0x1d   :  { %v127_v22 = vadd.f32 %v123_v8, %v119_v14  ;;  %v167_v23 = vadd.f32 %v163_v10, %v159_v15  ;;  %v120_v24 = vadd.f32 %v116_v20, %v112_v17  ;;  %v107_v29 = vld [vmem:[#allocation10 + $0x40] sm:$0xff]  ;;  %v113_v30 = vmul.f32 0.06, %v105_v28  ;;  %v109_v36 = vld [vmem:[#allocation10 + $0x50] sm:$0xff]  ;;  %v106_v41 = vld [vmem:[#allocation10 + $0x38] sm:$0xff]  ;;  %s1194_s18 = smov 64  }
  0x1e   :  { %v160_v26 = vadd.f32 %v156_v21, %v152_v18  ;;  %v117_v31 = vmul.f32 0.63, %v107_v29  ;;  %v153_v34 = vmul.f32 0.34, %v105_v28  ;;  %v157_v35 = vmul.f32 -0.6, %v107_v29 }
  0x1f   :  { %899 = vmatmul.msk.f32.vlgmr.msra.gmra.mxu1 %vm173_vm0, %v127_v22  ;;  %907 = vmatmul.msk.f32.vlgmr.msra.gmra.mxu2 %vm173_vm0, %v167_v23  ;;  %v128_v32 = vadd.f32 %v124_v25, %v120_v24  ;;  %v125_v38 = vmul.f32 0.27, %v109_v36  ;;  %v165_v40 = vmul.f32 0.17, %v109_v36  ;;  %v108_v42 = vld [vmem:[#allocation10 + $0x48] sm:$0xff]  ;;  %v110_v49 = vld [vmem:[#allocation10 + $0x58] sm:$0xff] }
  0x20   :  { %887 = vmatmul.msk.f32.vlgmr.msra.gmra.mxu0 %vm173_vm0, %v127_v22  ;;  %895 = vmatmul.msk.f32.vlgmr.msra.gmra.mxu3 %vm173_vm0, %v167_v23  ;;  %v168_v33 = vadd.f32 %v164_v27, %v160_v26  ;;  %v121_v37 = vadd.f32 %v117_v31, %v113_v30  ;;  %v161_v39 = vadd.f32 %v157_v35, %v153_v34  ;;  %v114_v43 = vmul.f32 0.06, %v106_v41  ;;  %s1195_s19 = smov 48   ;;  %s1196_s20 = smov 96  }
  0x21   :  { %v118_v44 = vmul.f32 0.63, %v108_v42  ;;  %v154_v47 = vmul.f32 0.34, %v106_v41  ;;  %v158_v48 = vmul.f32 -0.6, %v108_v42 }
  0x22   :  { %v129_v45 = vadd.f32 %v125_v38, %v121_v37  ;;  %v169_v46 = vadd.f32 %v165_v40, %v161_v39  ;;  %v126_v51 = vmul.f32 0.27, %v110_v49  ;;  %v166_v53 = vmul.f32 0.17, %v110_v49  ;;  %s1197_s21 = smov 112   ;;  %s1199_s10 = smov [#allocation11]  }
  0x23   :  { %v122_v50 = vadd.f32 %v118_v44, %v114_v43  ;;  %v162_v52 = vadd.f32 %v158_v48, %v154_v47  ;;  %v131_v56 = vmul.f32 0.3, %v1260_v2  ;;  %v135_v57 = vmul.f32 0.04, %v1262_v3  ;;  %s870_s11 = sshll.u32 %s1199_s10, 4  ;;  %s872_s13 = sshll.u32 %s1460_s5, 4  ;;  %s871_s11 = int_to_ptr.vmem [resolvable:$true] %s870_s11  ;;  %s873_s13 = int_to_ptr.hbm [resolvable:$true] %s872_s13 }
  0x24   :  { %v143_v59 = vmul.f32 -0.35, %v1264_v4  ;;  %v132_v61 = vmul.f32 0.3, %v1272_v13  ;;  %v136_v62 = vmul.f32 0.04, %v1274_v16 }
  0x25   :  { %v130_v54 = vadd.f32 %v126_v51, %v122_v50  ;;  %v170_v55 = vadd.f32 %v166_v53, %v162_v52  ;;  %v139_v58 = vadd.f32 %v135_v57, %v131_v56  ;;  %v144_v0 = vmul.f32 -0.35, %v1278_v19 }
  0x26   :  { %v140_v63 = vadd.f32 %v136_v62, %v132_v61  ;;  %v133_v2 = vmul.f32 0.3, %v105_v28  ;;  %v137_v3 = vmul.f32 0.04, %v107_v29  ;;  %v145_v5 = vmul.f32 -0.35, %v109_v36 }
  0x27   :  { %900 = vmatmul.msk.f32.gmra.mxu1 %vm173_vm0, %v128_v32  ;;  %908 = vmatmul.msk.f32.gmra.mxu2 %vm173_vm0, %v168_v33  ;;  %v147_v60 = vadd.f32 %v143_v59, %v139_v58  ;;  %v134_v7 = vmul.f32 0.3, %v106_v41  ;;  %v138_v8 = vmul.f32 0.04, %v108_v42  ;;  %v146_v10 = vmul.f32 -0.35, %v110_v49 }
  0x28   :  { %888 = vmatmul.msk.f32.gmra.mxu0 %vm173_vm0, %v128_v32  ;;  %896 = vmatmul.msk.f32.gmra.mxu3 %vm173_vm0, %v168_v33  ;;  %v148_v1 = vadd.f32 %v144_v0, %v140_v63  ;;  %v141_v4 = vadd.f32 %v137_v3, %v133_v2  ;;  %vm363_vm2 = vcmask 392192   ;;  %vm366_vm3 = vcmask 523264  }
  0x29   :  { %v142_v9 = vadd.f32 %v138_v8, %v134_v7  ;;  %vm369_vm4 = vcmask 654336   ;;  %vm432_vm5 = vcmask 785408  }
  0x2a   :  { %v149_v6 = vadd.f32 %v145_v5, %v141_v4 }
  0x2b   :  { %v150_v11 = vadd.f32 %v146_v10, %v142_v9 }
  0x2f   :  { %901 = vmatmul.msk.f32.gmra.mxu1 %vm173_vm0, %v129_v45  ;;  %909 = vmatmul.msk.f32.gmra.mxu2 %vm173_vm0, %v169_v46 }
  0x30   :  { %889 = vmatmul.msk.f32.gmra.mxu0 %vm173_vm0, %v129_v45  ;;  %897 = vmatmul.msk.f32.gmra.mxu3 %vm173_vm0, %v169_v46 }
  0x37   :  { %902 = vmatmul.msk.f32.gmra.mxu1 %vm173_vm0, %v130_v54  ;;  %910 = vmatmul.msk.f32.gmra.mxu2 %vm173_vm0, %v170_v55 }
  0x38   :  { %890 = vmatmul.msk.f32.gmra.mxu0 %vm173_vm0, %v130_v54  ;;  %898 = vmatmul.msk.f32.gmra.mxu3 %vm173_vm0, %v170_v55 }
  0x3f   :  { %903 = vmatmul.msk.f32.gmra.mxu1 %vm173_vm0, %v147_v60 }
  0x40   :  { %891 = vmatmul.msk.f32.gmra.mxu0 %vm173_vm0, %v147_v60 }
  0x47   :  { %904 = vmatmul.msk.f32.gmra.mxu1 %vm173_vm0, %v148_v1 }
  0x48   :  { %892 = vmatmul.msk.f32.gmra.mxu0 %vm173_vm0, %v148_v1 }
  0x4f   :  { %905 = vmatmul.msk.f32.gmra.mxu1 %vm173_vm0, %v149_v6 }
  0x50   :  { %893 = vmatmul.msk.f32.gmra.mxu0 %vm173_vm0, %v149_v6 }
  0x57   :  { %906 = vmatmul.msk.f32.gmra.mxu1 %vm173_vm0, %v150_v11 }
  0x58   :  { %894 = vmatmul.msk.f32.gmra.mxu0 %vm173_vm0, %v150_v11 }
  0x9c   :  { %v1314_v12 = vpop.f32.mrf.mxu1 }
  0x9d   :  { %v1316_v13 = vpop.f32.mrf.mxu0 }
  0xa2   :  { %v306_v14 = vpop.f32.mrf.mxu2 }
  0xa3   :  { %v251_v21 = vpop.f32.mrf.mxu3 }
  0xa4   :  { %v285_v15 = vpop.f32.mrf.mxu1 }
  0xa5   :  { %v1318_v16 = vpop.f32.mrf.mxu0 }
  0xaa   :  { %v309_v17 = vpop.f32.mrf.mxu2 }
  0xab   :  { %v254_v28 = vpop.f32.mrf.mxu3  ;;  %v966_v43 = vpack.i.bf16 %v306_v14, %v309_v17 }
  0xac   :  { %v288_v18 = vpop.f32.mrf.mxu1  ;;  %v986_v35 = vpack.i.bf16 %v251_v21, %v254_v28 }
  0xad   :  { %v233_v19 = vpop.f32.mrf.mxu0 }
  0xb2   :  { %v312_v20 = vpop.f32.mrf.mxu2 }
  0xb3   :  { %v257_v33 = vpop.f32.mrf.mxu3 }
  0xb4   :  { %v291_v22 = vpop.f32.mrf.mxu1 }
  0xb5   :  { %v951_v23 = vpack.i.bf16 %v288_v18, %v291_v22  ;;  %v236_v24 = vpop.f32.mrf.mxu0 }
  0xb6   :  { %v976_v30 = vpack.i.bf16 %v233_v19, %v236_v24 }
  0xb7   :  { %952 = vrot.lane.b32.xlu0 %v951_v23, %s1191_s4 }
  0xba   :  { %v315_v25 = vpop.f32.mrf.mxu2 }
  0xbb   :  { %v971_v26 = vpack.i.bf16 %v312_v20, %v315_v25  ;;  %v260_v38 = vpop.f32.mrf.mxu3 }
  0xbc   :  { %v294_v27 = vpop.f32.mrf.mxu1  ;;  %v991_v39 = vpack.i.bf16 %v257_v33, %v260_v38 }
  0xbd   :  { %972 = vrot.lane.b32.xlu2 %v971_v26, %s1192_s16  ;;  %v239_v29 = vpop.f32.mrf.mxu0 }
  0xc4   :  { %v297_v31 = vpop.f32.mrf.mxu1 }
  0xc5   :  { %v956_v32 = vpack.i.bf16 %v294_v27, %v297_v31  ;;  %977 = vrot.lane.b32.xlu2 %v976_v30, %s1191_s4  ;;  %v242_v34 = vpop.f32.mrf.mxu0 }
  0xc6   :  { %v981_v36 = vpack.i.bf16 %v239_v29, %v242_v34 }
  0xc7   :  { %957 = vrot.lane.b32.xlu0 %v956_v32, %s1193_s17 }
  0xcc   :  { %v300_v37 = vpop.f32.mrf.mxu1 }
  0xcd   :  { %987 = vrot.lane.b32.xlu2 %v986_v35, %s1194_s18  ;;  %v245_v42 = vpop.f32.mrf.mxu0 }
  0xcf   :  { %982 = vrot.lane.b32.xlu0 %v981_v36, %s1193_s17 }
  0xd4   :  { %v303_v40 = vpop.f32.mrf.mxu1 }
  0xd5   :  { %v961_v41 = vpack.i.bf16 %v300_v37, %v303_v40  ;;  %v248_v44 = vpop.f32.mrf.mxu0  ;;  %v422_v37 = vld [vmem:[#allocation2] sm:$0xff]  ;;  %v487_v40 = vld [vmem:[#allocation5] sm:$0xff] }
  0xd6   :  { %v996_v45 = vpack.i.bf16 %v245_v42, %v248_v44 }
  0xd7   :  { %962 = vrot.lane.b32.xlu1 %v961_v41, %s1195_s19  ;;  %992 = vrot.lane.b32.xlu0 %v991_v39, %s1192_s16  ;;  %v423_v39 = vld [vmem:[#allocation2 + $0x8] sm:$0xff]  ;;  %v488_v41 = vld [vmem:[#allocation5 + $0x8] sm:$0xff] }
  0xdf   :  { %967 = vrot.lane.b32.xlu1 %v966_v43, %s1194_s18 }
  0xe7   :  { %997 = vrot.lane.b32.xlu1 %v996_v45, %s1195_s19 }
 0x117   :  { %v973_v47 = vpop.permute.xlu2 %972 }
 0x118   :  { %v975_v1 = vunpack.i.h.bf16 %v973_v47  ;;  %v974_v2 = vunpack.i.l.bf16 %v973_v47 }
 0x11f   :  { %v978_v52 = vpop.permute.xlu2 %977 }
 0x120   :  { %v980_v7 = vunpack.i.h.bf16 %v978_v52  ;;  %v979_v8 = vunpack.i.l.bf16 %v978_v52 }
 0x122   :  { %v358_v18 = vsel %vm173_vm0, %v1316_v13, %v980_v7  ;;  %v359_v19 = vsel %vm173_vm0, %v1318_v16, %v979_v8 }
 0x129   :  { %v953_v46 = vpop.permute.xlu0 %952 }
 0x12a   :  { %v955_v50 = vunpack.i.h.bf16 %v953_v46  ;;  %v954_v51 = vunpack.i.l.bf16 %v953_v46 }
 0x12c   :  { %v412_v58 = vsel %vm173_vm0, %v1314_v12, %v955_v50  ;;  %v413_v59 = vsel %vm173_vm0, %v285_v15, %v954_v51  ;;  %v988_v12 = vpop.permute.xlu2 %987 }
 0x12d   :  { %v990_v21 = vunpack.i.h.bf16 %v988_v12  ;;  %v989_v22 = vunpack.i.l.bf16 %v988_v12 }
 0x139   :  { %v958_v48 = vpop.permute.xlu0 %957 }
 0x13a   :  { %v960_v53 = vunpack.i.h.bf16 %v958_v48  ;;  %v959_v54 = vunpack.i.l.bf16 %v958_v48 }
 0x13c   :  { %v414_v61 = vsel %vm360_vm1, %v412_v58, %v960_v53  ;;  %v415_v62 = vsel %vm360_vm1, %v413_v59, %v959_v54 }
 0x141   :  { %v983_v55 = vpop.permute.xlu0 %982 }
 0x142   :  { %v985_v14 = vunpack.i.h.bf16 %v983_v55  ;;  %v984_v15 = vunpack.i.l.bf16 %v983_v55 }
 0x144   :  { %v361_v27 = vsel %vm360_vm1, %v358_v18, %v985_v14  ;;  %v362_v28 = vsel %vm360_vm1, %v359_v19, %v984_v15 }
 0x149   :  { %v963_v49 = vpop.permute.xlu1 %962  ;;  %v993_v17 = vpop.permute.xlu0 %992 }
 0x14a   :  { %v965_v56 = vunpack.i.h.bf16 %v963_v49  ;;  %v964_v57 = vunpack.i.l.bf16 %v963_v49  ;;  %v995_v25 = vunpack.i.h.bf16 %v993_v17  ;;  %v994_v26 = vunpack.i.l.bf16 %v993_v17 }
 0x14c   :  { %v416_v3 = vsel %vm363_vm2, %v414_v61, %v965_v56  ;;  %v417_v4 = vsel %vm363_vm2, %v415_v62, %v964_v57 }
 0x151   :  { %v968_v60 = vpop.permute.xlu1 %967 }
 0x152   :  { %v970_v63 = vunpack.i.h.bf16 %v968_v60  ;;  %v969_v0 = vunpack.i.l.bf16 %v968_v60 }
 0x154   :  { %v418_v5 = vsel %vm366_vm3, %v416_v3, %v970_v63  ;;  %v419_v6 = vsel %vm366_vm3, %v417_v4, %v969_v0 }
 0x155   :  { %v420_v9 = vsel %vm369_vm4, %v418_v5, %v975_v1  ;;  %v421_v10 = vsel %vm369_vm4, %v419_v6, %v974_v2 }
 0x156   :  { %v1001_v11 = vpack.i.bf16 %v420_v9, %v421_v10 }
 0x158   :  { %1002 = vrot.lane.b32.xlu1 %v1001_v11, %s1196_s20 }
 0x159   :  { %v998_v20 = vpop.permute.xlu1 %997 }
 0x15a   :  { %v1000_v23 = vunpack.i.h.bf16 %v998_v20  ;;  %v999_v24 = vunpack.i.l.bf16 %v998_v20 }
 0x15c   :  { %v364_v29 = vsel %vm363_vm2, %v361_v27, %v1000_v23  ;;  %v365_v30 = vsel %vm363_vm2, %v362_v28, %v999_v24 }
 0x15d   :  { %v368_v13 = vsel %vm366_vm3, %v365_v30, %v989_v22  ;;  %v367_v31 = vsel %vm366_vm3, %v364_v29, %v990_v21 }
 0x15e   :  { %v371_v16 = vsel %vm369_vm4, %v368_v13, %v994_v26  ;;  %v370_v32 = vsel %vm369_vm4, %v367_v31, %v995_v25 }
 0x1ca   :  { %v1003_v33 = vpop.permute.xlu1 %1002 }
 0x1cb   :  { %v1004_v34 = vunpack.i.l.bf16 %v1003_v33  ;;  %v1005_v35 = vunpack.i.h.bf16 %v1003_v33 }
 0x1cd   :  { %478 = vmatpush.msrb.mxu3 %v1004_v34  ;;  %v434_v36 = vsel %vm432_vm5, %v371_v16, %v1004_v34  ;;  %v433_v38 = vsel %vm432_vm5, %v370_v32, %v1005_v35 }
 0x1ce   :  { %455 = vmatpush.msrb.mxu2 %v434_v36 }
 0x1cf   :  { %479 = vmatpush.msrb.mxu3 %v1005_v35 }
 0x1d0   :  { %456 = vmatpush.msrb.mxu2 %v433_v38  ;;  %913 = vmatmul.msk.f32.vlgmr.msrb.gmra.mxu3 %vm173_vm0, %v422_v37 }
 0x1d1   :  { %911 = vmatmul.msk.f32.vlgmr.msrb.gmra.mxu2 %vm173_vm0, %v422_v37 }
 0x1d2   :  { %509 = vmatpush.msra.mxu2 %v371_v16 }
 0x1d4   :  { %510 = vmatpush.msra.mxu2 %v370_v32 }
 0x1d8   :  { %914 = vmatmul.msk.f32.gmra.mxu3 %vm173_vm0, %v423_v39 }
 0x1d9   :  { %912 = vmatmul.msk.f32.gmra.mxu2 %vm173_vm0, %v423_v39 }
 0x1e1   :  { %915 = vmatmul.msk.f32.vlgmr.msra.gmra.mxu2 %vm173_vm0, %v487_v40 }
 0x1e9   :  { %916 = vmatmul.msk.f32.gmra.mxu2 %vm173_vm0, %v488_v41 }
 0x253   :  { %v1386_v28 = vpop.f32.mrf.mxu3 }
 0x254   :  { %v458_v42 = vpop.f32.mrf.mxu2 }
 0x255   :  { %v1354_v43 = vadd.f32 1e-05, %v458_v42 }
 0x257   :  { %552 = vrot.lane.b32.xlu1 %v1354_v43, %s1193_s17  ;;  %624 = vrot.lane.b32.xlu2 %v1354_v43, %s1196_s20 }
 0x25c   :  { %v1360_v44 = vpop.f32.mrf.mxu2 }
 0x25d   :  { %v1363_v45 = vadd.f32 1e-05, %v1360_v44 }
 0x25f   :  { %626 = vrot.lane.b32.xlu0 %v1363_v45, %s1196_s20  ;;  %590 = vrot.lane.b32.xlu1 %v1363_v45, %s1194_s18 }
 0x260   :  { %554 = vrot.lane.b32.xlu2 %v1363_v45, %s1193_s17 }
 0x264   :  { %v1373_v58 = vpop.f32.mrf.mxu2 }
 0x267   :  { %588 = vrot.lane.b32.xlu0 %v1354_v43, %s1194_s18 }
 0x26c   :  { %v1376_v7 = vpop.f32.mrf.mxu2 }
 0x2b1   :  { %v625_v46 = vpop.permute.xlu2 %624 }
 0x2b2   :  { %1006 = vrcp.f32 %v625_v46  ;;  %v641_v51 = vand.u32 2147483648, %v625_v46  ;;  %v639_v53 = vand.u32 2147483647, %v625_v46  ;;  %vm635_vm7 = vweird.f32 %v625_v46 }
 0x2b4   :  { %v642_v55 = vor.u32 1.1754944e-38, %v641_v51  ;;  %vm640_vm9 = vcmp.eq.f32.partialorder %v639_v53, 8.507059e+37 }
 0x2b8   :  { %v1007_v47 = vpop.eup %1006 }
 0x2b9   :  { %v631_v48 = vmul.f32 %v1007_v47, %v625_v46  ;;  %vm636_vm6 = vweird.f32 %v1007_v47 }
 0x2ba   :  { %v555_v49 = vpop.permute.xlu2 %554  ;;  %vm637_vm8 = vmor %vm635_vm7, %vm636_vm6 }
 0x2bb   :  { %v632_v50 = vsub.f32 1.0, %v631_v48  ;;  %1008 = vrcp.f32 %v555_v49  ;;  %v584_v1 = vand.u32 2147483648, %v555_v49  ;;  %v582_v2 = vand.u32 2147483647, %v555_v49 }
 0x2bc   :  { %vm578_vm11 = vweird.f32 %v555_v49 }
 0x2bd   :  { %v633_v52 = vmul.f32 %v1007_v47, %v632_v50  ;;  %v585_v5 = vor.u32 1.1754944e-38, %v584_v1  ;;  %vm583_vm13 = vcmp.eq.f32.partialorder %v582_v2, 8.507059e+37 }
 0x2bf   :  { %v634_v54 = vadd.f32 %v1007_v47, %v633_v52 }
 0x2c1   :  { %v1009_v56 = vpop.eup %1008  ;;  %v638_v57 = vsel %vm637_vm8, %v1007_v47, %v634_v54 }
 0x2c2   :  { %v643_v59 = vsel %vm640_vm9, %v642_v55, %v638_v57  ;;  %v574_v60 = vmul.f32 %v1009_v56, %v555_v49  ;;  %vm579_vm10 = vweird.f32 %v1009_v56 }
 0x2c3   :  { %v644_v61 = vmul.f32 %v643_v59, %v458_v42  ;;  %vm580_vm12 = vmor %vm578_vm11, %vm579_vm10 }
 0x2c4   :  { %v575_v62 = vsub.f32 1.0, %v574_v60 }
 0x2c5   :  { %v666_v63 = vmul.f32 %v644_v61, %v644_v61 }
 0x2c6   :  { %v576_v0 = vmul.f32 %v1009_v56, %v575_v62 }
 0x2c7   :  { %670 = vrot.lane.b32.xlu2 %v666_v63, %s1193_s17 }
 0x2c8   :  { %v577_v3 = vadd.f32 %v1009_v56, %v576_v0 }
 0x2c9   :  { %v553_v4 = vpop.permute.xlu1 %552 }
 0x2ca   :  { %1010 = vrcp.f32 %v553_v4  ;;  %v581_v6 = vsel %vm580_vm12, %v1009_v56, %v577_v3  ;;  %v569_v18 = vand.u32 2147483648, %v553_v4  ;;  %v567_v20 = vand.u32 2147483647, %v553_v4 }
 0x2cb   :  { %v1378_v8 = vsel %vm583_vm13, %v585_v5, %v581_v6  ;;  %vm563_vm15 = vweird.f32 %v553_v4  ;;  %v484_v5 = vpop.f32.mrf.mxu3 }
 0x2cc   :  { %v587_v9 = vmul.f32 %v1378_v8, %v1376_v7  ;;  %v570_v23 = vor.u32 1.1754944e-38, %v569_v18  ;;  %vm568_vm3 = vcmp.eq.f32.partialorder %v567_v20, 8.507059e+37  ;;  %v663_v6 = vmul.f32 %v1378_v8, %v484_v5 }
 0x2cd   :  { %v529_v8 = vand.u32 2147483647, %v1354_v43 }
 0x2ce   :  { %v679_v10 = vmul.f32 %v587_v9, %v587_v9  ;;  %v707_v9 = vmul.f32 %v663_v6, %v663_v6 }
 0x2d0   :  { %v1011_v11 = vpop.eup %1010  ;;  %684 = vrot.lane.b32.xlu2 %v679_v10, %s1196_s20 }
 0x2d1   :  { %v559_v12 = vmul.f32 %v1011_v11, %v553_v4  ;;  %v1382_v14 = vpop.permute.xlu0 %626  ;;  %v591_v15 = vpop.permute.xlu1 %590  ;;  %vm564_vm14 = vweird.f32 %v1011_v11 }
 0x2d2   :  { %1012 = vrcp.f32 %v1382_v14  ;;  %vm565_vm2 = vmor %vm563_vm15, %vm564_vm14  ;;  %v620_v33 = vand.u32 2147483648, %v591_v15  ;;  %v618_v37 = vand.u32 2147483647, %v591_v15  ;;  %vm614_vm5 = vweird.f32 %v591_v15 }
 0x2d3   :  { %v560_v17 = vsub.f32 1.0, %v559_v12  ;;  %1014 = vrcp.f32 %v591_v15  ;;  %v656_v56 = vand.u32 2147483648, %v1382_v14  ;;  %vm650_vm12 = vweird.f32 %v1382_v14 }
 0x2d4   :  { %v621_v41 = vor.u32 1.1754944e-38, %v620_v33  ;;  %vm619_vm7 = vcmp.eq.f32.partialorder %v618_v37, 8.507059e+37  ;;  %v654_v60 = vand.u32 2147483647, %v1382_v14 }
 0x2d5   :  { %v561_v19 = vmul.f32 %v1011_v11, %v560_v17  ;;  %v657_v0 = vor.u32 1.1754944e-38, %v656_v56  ;;  %v531_v17 = vand.u32 2147483648, %v1354_v43 }
 0x2d6   :  { %vm655_vm15 = vcmp.eq.f32.partialorder %v654_v60, 8.507059e+37 }
 0x2d7   :  { %v562_v21 = vadd.f32 %v1011_v11, %v561_v19  ;;  %v532_v20 = vor.u32 1.1754944e-38, %v531_v17 }
 0x2d8   :  { %v1013_v22 = vpop.eup %1012 }
 0x2d9   :  { %v1015_v24 = vpop.eup %1014  ;;  %v589_v25 = vpop.permute.xlu0 %588  ;;  %v566_v26 = vsel %vm565_vm2, %v1011_v11, %v562_v21  ;;  %v646_v29 = vmul.f32 %v1013_v22, %v1382_v14  ;;  %vm651_vm9 = vweird.f32 %v1013_v22 }
 0x2da   :  { %1016 = vrcp.f32 %v589_v25  ;;  %v571_v27 = vsel %vm568_vm3, %v570_v23, %v566_v26  ;;  %v610_v13 = vmul.f32 %v1015_v24, %v591_v15  ;;  %vm615_vm4 = vweird.f32 %v1015_v24  ;;  %vm652_vm14 = vmor %vm650_vm12, %vm651_vm9 }
 0x2db   :  { %v572_v30 = vmul.f32 %v571_v27, %v1373_v58  ;;  %v662_v31 = vmul.f32 %v571_v27, %v1386_v28  ;;  %v647_v35 = vsub.f32 1.0, %v646_v29  ;;  %vm616_vm6 = vmor %vm614_vm5, %vm615_vm4  ;;  %v605_v48 = vand.u32 2147483648, %v589_v25 }
 0x2dc   :  { %v611_v32 = vsub.f32 1.0, %v610_v13  ;;  %v603_v51 = vand.u32 2147483647, %v589_v25  ;;  %vm599_vm10 = vweird.f32 %v589_v25  ;;  %1018 = vrcp.f32 %v1354_v43 }
 0x2dd   :  { %v678_v16 = vmul.f32 %v572_v30, %v572_v30  ;;  %v706_v34 = vmul.f32 %v662_v31, %v662_v31  ;;  %v648_v42 = vmul.f32 %v1013_v22, %v647_v35  ;;  %v606_v57 = vor.u32 1.1754944e-38, %v605_v48 }
 0x2de   :  { %v612_v36 = vmul.f32 %v1015_v24, %v611_v32  ;;  %vm604_vm13 = vcmp.eq.f32.partialorder %v603_v51, 8.507059e+37  ;;  %1020 = vrcp.f32 %v1363_v45  ;;  %vm525_vm3 = vweird.f32 %v1354_v43 }
 0x2df   :  { %682 = vrot.lane.b32.xlu1 %v678_v16, %s1196_s20  ;;  %710 = vrot.lane.b32.xlu2 %v706_v34, %s1196_s20  ;;  %v649_v54 = vadd.f32 %v1013_v22, %v648_v42  ;;  %vm530_vm5 = vcmp.eq.f32.partialorder %v529_v8, 8.507059e+37  ;;  %v544_v16 = vand.u32 2147483647, %v1363_v45 }
 0x2e0   :  { %v1017_v38 = vpop.eup %1016  ;;  %v613_v40 = vadd.f32 %v1015_v24, %v612_v36 }
 0x2e1   :  { %v595_v39 = vmul.f32 %v1017_v38, %v589_v25  ;;  %vm600_vm8 = vweird.f32 %v1017_v38  ;;  %v653_v63 = vsel %vm652_vm14, %v1013_v22, %v649_v54  ;;  %vm545_vm9 = vcmp.eq.f32.partialorder %v544_v16, 8.507059e+37 }
 0x2e2   :  { %v617_v47 = vsel %vm616_vm6, %v1015_v24, %v613_v40  ;;  %vm601_vm11 = vmor %vm599_vm10, %vm600_vm8  ;;  %v658_v2 = vsel %vm655_vm15, %v657_v0, %v653_v63  ;;  %v1019_v10 = vpop.eup %1018 }
 0x2e3   :  { %v596_v46 = vsub.f32 1.0, %v595_v39  ;;  %v622_v49 = vsel %vm619_vm7, %v621_v41, %v617_v47  ;;  %v659_v3 = vmul.f32 %v658_v2, %v1360_v44  ;;  %v521_v11 = vmul.f32 %v1019_v10, %v1354_v43 }
 0x2e4   :  { %v623_v52 = vmul.f32 %v622_v49, %v1376_v7  ;;  %vm526_vm2 = vweird.f32 %v1019_v10  ;;  %v1021_v44 = vpop.eup %1020  ;;  %v546_v43 = vand.u32 2147483648, %v1363_v45  ;;  %vm540_vm7 = vweird.f32 %v1363_v45 }
 0x2e5   :  { %v597_v50 = vmul.f32 %v1017_v38, %v596_v46  ;;  %v667_v4 = vmul.f32 %v659_v3, %v659_v3  ;;  %v522_v12 = vsub.f32 1.0, %v521_v11  ;;  %vm527_vm4 = vmor %vm525_vm3, %vm526_vm2  ;;  %v536_v19 = vmul.f32 %v1021_v44, %v1363_v45 }
 0x2e6   :  { %v695_v55 = vmul.f32 %v623_v52, %v623_v52  ;;  %vm541_vm6 = vweird.f32 %v1021_v44 }
 0x2e7   :  { %v598_v53 = vadd.f32 %v1017_v38, %v597_v50  ;;  %v523_v14 = vmul.f32 %v1019_v10, %v522_v12  ;;  %v537_v23 = vsub.f32 1.0, %v536_v19  ;;  %vm542_vm8 = vmor %vm540_vm7, %vm541_vm6 }
 0x2e8   :  { %700 = vrot.lane.b32.xlu1 %v695_v55, %s1194_s18 }
 0x2e9   :  { %v602_v59 = vsel %vm601_vm11, %v1017_v38, %v598_v53  ;;  %v524_v15 = vadd.f32 %v1019_v10, %v523_v14  ;;  %v538_v25 = vmul.f32 %v1021_v44, %v537_v23 }
 0x2ea   :  { %v607_v61 = vsel %vm604_vm13, %v606_v57, %v602_v59 }
 0x2eb   :  { %v608_v62 = vmul.f32 %v607_v61, %v1373_v58  ;;  %v528_v18 = vsel %vm527_vm4, %v1019_v10, %v524_v15  ;;  %v539_v30 = vadd.f32 %v1021_v44, %v538_v25 }
 0x2ec   :  { %v533_v21 = vsel %vm530_vm5, %v532_v20, %v528_v18 }
 0x2ed   :  { %v694_v1 = vmul.f32 %v608_v62, %v608_v62  ;;  %v534_v24 = vmul.f32 %v533_v21, %v1373_v58  ;;  %v660_v29 = vmul.f32 %v533_v21, %v1386_v28  ;;  %v543_v34 = vsel %vm542_vm8, %v1021_v44, %v539_v30 }
 0x2ee   :  { %v547_v58 = vor.u32 1.1754944e-38, %v546_v43 }
 0x2ef   :  { %698 = vrot.lane.b32.xlu0 %v694_v1, %s1194_s18  ;;  %v664_v26 = vmul.f32 %v534_v24, %v534_v24  ;;  %v690_v33 = vmul.f32 %v660_v29, %v660_v29 }
 0x2f0   :  { %v548_v36 = vsel %vm545_vm9, %v547_v58, %v543_v34 }
 0x2f1   :  { %v549_v39 = vmul.f32 %v548_v36, %v1376_v7  ;;  %v661_v42 = vmul.f32 %v548_v36, %v484_v5 }
 0x2f3   :  { %v665_v46 = vmul.f32 %v549_v39, %v549_v39  ;;  %v691_v48 = vmul.f32 %v661_v42, %v661_v42 }
 0x2f7   :  { %672 = vrot.lane.b32.xlu0 %v667_v4, %s1193_s17  ;;  %v1198_v4 = vmov 256.0  }
 0x2ff   :  { %712 = vrot.lane.b32.xlu0 %v707_v9, %s1196_s20 }
 0x321   :  { %v671_v22 = vpop.permute.xlu2 %670 }
 0x322   :  { %v676_v13 = vadd.f32 %v671_v22, %v664_v26 }
 0x32a   :  { %v685_v31 = vpop.permute.xlu2 %684 }
 0x339   :  { %v711_v38 = vpop.permute.xlu2 %710 }
 0x351   :  { %v683_v27 = vpop.permute.xlu1 %682 }
 0x352   :  { %v688_v32 = vadd.f32 %v683_v27, %v676_v13 }
 0x354   :  { %v692_v35 = vadd.f32 %v690_v33, %v688_v32 }
 0x35a   :  { %v701_v52 = vpop.permute.xlu1 %700 }
 0x361   :  { %v699_v37 = vpop.permute.xlu0 %698 }
 0x362   :  { %v704_v28 = vadd.f32 %v699_v37, %v692_v35 }
 0x364   :  { %v716_v40 = vadd.f32 %v711_v38, %v704_v28 }
 0x366   :  { %v718_v41 = vadd.f32 1e-05, %v716_v40 }
 0x368   :  { %1022 = vlog2.f32 %v718_v41 }
 0x369   :  { %v673_v47 = vpop.permute.xlu0 %672 }
 0x36a   :  { %v677_v45 = vadd.f32 %v673_v47, %v665_v46 }
 0x36c   :  { %v689_v49 = vadd.f32 %v685_v31, %v677_v45 }
 0x36e   :  { %v1023_v50 = vpop.eup %1022  ;;  %v693_v51 = vadd.f32 %v691_v48, %v689_v49 }
 0x36f   :  { %v721_v53 = vmul.f32 0.6931472, %v1023_v50 }
 0x370   :  { %v705_v54 = vadd.f32 %v701_v52, %v693_v51 }
 0x371   :  { %v713_v55 = vpop.permute.xlu0 %712  ;;  %747 = vrot.lane.b32.xlu1 %v721_v53, %s1197_s21  ;;  %v724_v60 = vsel %vm173_vm0, %v721_v53, 0.0 }
 0x372   :  { %v717_v56 = vadd.f32 %v713_v55, %v705_v54 }
 0x374   :  { %v719_v7 = vadd.f32 1e-05, %v717_v56 }
 0x376   :  { %1024 = vlog2.f32 %v719_v7 }
 0x377   :  { %1026 = vrcp.f32 %v1198_v4 }
 0x37c   :  { %v1025_v57 = vpop.eup %1024 }
 0x37d   :  { %v723_v59 = vmul.f32 0.6931472, %v1025_v57  ;;  %v1027_v5 = vpop.eup %1026 }
 0x37e   :  { %v737_v6 = vmul.f32 256.0, %v1027_v5  ;;  %vm741_vm10 = vweird.f32 %v1027_v5 }
 0x37f   :  { %749 = vrot.lane.b32.xlu2 %v723_v59, %s1197_s21  ;;  %v725_v61 = vsel %vm173_vm0, %v723_v59, 0.0 }
 0x380   :  { %v726_v62 = vadd.f32 %v725_v61, %v724_v60  ;;  %v738_v9 = vsub.f32 1.0, %v737_v6 }
 0x382   :  { %727 = vadd.xlane.f32.xlu0 %v726_v62  ;;  %v739_v14 = vmul.f32 %v1027_v5, %v738_v9 }
 0x384   :  { %v740_v17 = vadd.f32 %v1027_v5, %v739_v14 }
 0x386   :  { %v742_v19 = vsel %vm741_vm10, %v1027_v5, %v740_v17 }
 0x3d9   :  { %v750_v63 = vpop.permute.xlu2 %749 }
 0x3da   :  { %v754_v1 = vsel %vm173_vm0, %v750_v63, 0.0 }
 0x3e3   :  { %v748_v0 = vpop.permute.xlu1 %747 }
 0x3e4   :  { %v753_v2 = vsel %vm173_vm0, %v748_v0, 0.0 }
 0x3e5   :  { %v755_v3 = vadd.f32 %v754_v1, %v753_v2 }
 0x3e7   :  { %756 = vadd.xlane.f32.xlu1 %v755_v3 }
 0x3f5   :  { %v728_v10 = vpop.xlane.xlu0 %727 }
 0x3f6   :  { %v729_v11 = vrot.slane %v728_v10, 4 }
 0x3f8   :  { %v730_v12 = vadd.f32 %v729_v11, %v728_v10 }
 0x3fa   :  { %v731_v15 = vrot.slane %v730_v12, 2 }
 0x3fc   :  { %v732_v44 = vadd.f32 %v731_v15, %v730_v12 }
 0x3fe   :  { %v733_v8 = vrot.slane %v732_v44, 1 }
 0x400   :  { %v734_v18 = vadd.f32 %v733_v8, %v732_v44 }
 0x402   :  { %921 = vpush %v734_v18 }
 0x403   :  { %923 = vpush %v742_v19 }
 0x433   :  { %s922_s22 = spop %921 }
 0x434   :  { %s1423_s23 = spop %923 }
 0x435   :  { %s744_s24 = smul.f32 %s1423_s23, %s922_s22 }
 0x437   :  { %v774_v27 = vstv %s744_s24 }
 0x45a   :  { %v757_v20 = vpop.xlane.xlu1 %756 }
 0x45b   :  { %v758_v21 = vrot.slane %v757_v20, 4 }
 0x45d   :  { %v759_v22 = vadd.f32 %v758_v21, %v757_v20 }
 0x45f   :  { %v760_v23 = vrot.slane %v759_v22, 2 }
 0x461   :  { %v761_v24 = vadd.f32 %v760_v23, %v759_v22 }
 0x463   :  { %v762_v25 = vrot.slane %v761_v24, 1 }
 0x465   :  { %v763_v26 = vadd.f32 %v762_v25, %v761_v24 }
 0x467   :  { %925 = vpush %v763_v26 }
 0x498   :  { %s926_s25 = spop %925 }
 0x499   :  { %s773_s28 = smul.f32 %s926_s25, %s1423_s23 }
 0x49b   :  { %v775_v29 = vstv %s773_s28 }
 0x49c   :  { %v776_v30 = vsel %vm173_vm0, %v774_v27, %v775_v29 }
 0x49d   :  { %v777_v13 = vperm.slane %v776_v30, 0 }
 0x49f   :  { %v1428_v43 = vsub.f32 %v721_v53, %v777_v13  ;;  %v1433_v16 = vsub.f32 %v723_v59, %v777_v13 }
 0x4a1   :  { %v780_v31 = vmul.f32 %v1428_v43, %v1428_v43  ;;  %v781_v32 = vmul.f32 %v1433_v16, %v1433_v16 }
 0x4a3   :  { %805 = vrot.lane.b32.xlu2 %v780_v31, %s1197_s21  ;;  %v782_v33 = vsel %vm173_vm0, %v780_v31, 0.0  ;;  %v783_v34 = vsel %vm173_vm0, %v781_v32, 0.0 }
 0x4a4   :  { %v784_v58 = vadd.f32 %v783_v34, %v782_v33 }
 0x4ab   :  { %807 = vrot.lane.b32.xlu2 %v781_v32, %s1197_s21 }
 0x4d4   :  { %785 = vadd.xlane.f32.xlu2 %v784_v58 }
 0x4fd   :  { %v806_v35 = vpop.permute.xlu2 %805 }
 0x4fe   :  { %v811_v37 = vsel %vm173_vm0, %v806_v35, 0.0 }
 0x505   :  { %v808_v36 = vpop.permute.xlu2 %807 }
 0x506   :  { %v812_v28 = vsel %vm173_vm0, %v808_v36, 0.0 }
 0x507   :  { %v813_v38 = vadd.f32 %v812_v28, %v811_v37 }
 0x509   :  { %814 = vadd.xlane.f32.xlu0 %v813_v38 }
 0x547   :  { %v786_v39 = vpop.xlane.xlu2 %785 }
 0x548   :  { %v787_v40 = vrot.slane %v786_v39, 4 }
 0x54a   :  { %v788_v41 = vadd.f32 %v787_v40, %v786_v39 }
 0x54c   :  { %v789_v42 = vrot.slane %v788_v41, 2 }
 0x54e   :  { %v790_v46 = vadd.f32 %v789_v42, %v788_v41 }
 0x550   :  { %v791_v47 = vrot.slane %v790_v46, 1 }
 0x552   :  { %v792_v45 = vadd.f32 %v791_v47, %v790_v46 }
 0x554   :  { %927 = vpush %v792_v45 }
 0x57c   :  { %v815_v48 = vpop.xlane.xlu0 %814 }
 0x57d   :  { %v816_v49 = vrot.slane %v815_v48, 4 }
 0x57f   :  { %v817_v50 = vadd.f32 %v816_v49, %v815_v48 }
 0x581   :  { %v818_v51 = vrot.slane %v817_v50, 2 }
 0x583   :  { %v819_v52 = vadd.f32 %v818_v51, %v817_v50 }
 0x585   :  { %s928_s29 = spop %927  ;;  %v820_v53 = vrot.slane %v819_v52, 1 }
 0x586   :  { %s802_s30 = smul.f32 %s928_s29, %s1423_s23 }
 0x587   :  { %v821_v54 = vadd.f32 %v820_v53, %v819_v52 }
 0x588   :  { %s832_s6 = sadd.f32 1e-05, %s802_s30 }
 0x589   :  { %929 = vpush %v821_v54 }
 0x58a   :  { %v833_v55 = vstv %s832_s6 }
 0x58b   :  { %1028 = vrsqrt.f32 %v833_v55  ;;  %vm840_vm12 = vweird.f32 %v833_v55 }
 0x591   :  { %v1029_v56 = vpop.eup %1028 }
 0x592   :  { %v835_v7 = vmul.f32 %v1029_v56, %v833_v55  ;;  %vm841_vm11 = vweird.f32 %v1029_v56 }
 0x593   :  { %vm842_vm13 = vmor %vm840_vm12, %vm841_vm11 }
 0x594   :  { %v836_v57 = vmul.f32 %v1029_v56, %v835_v7 }
 0x596   :  { %v837_v59 = vmul.f32 0.5, %v836_v57 }
 0x598   :  { %v838_v60 = vsub.f32 1.5, %v837_v59 }
 0x59a   :  { %v839_v61 = vmul.f32 %v1029_v56, %v838_v60 }
 0x59c   :  { %v843_v62 = vsel %vm842_vm13, %v1029_v56, %v839_v61 }
 0x59d   :  { %931 = vpush %v843_v62 }
 0x5ba   :  { %s930_s1 = spop %929 }
 0x5bb   :  { %s831_s3 = smul.f32 %s930_s1, %s1423_s23 }
 0x5bd   :  { %s846_s7 = sadd.f32 1e-05, %s831_s3 }
 0x5bf   :  { %v847_v63 = vstv %s846_s7 }
 0x5c0   :  { %1030 = vrsqrt.f32 %v847_v63  ;;  %vm854_vm15 = vweird.f32 %v847_v63 }
 0x5c6   :  { %v1031_v0 = vpop.eup %1030 }
 0x5c7   :  { %v849_v1 = vmul.f32 %v1031_v0, %v847_v63  ;;  %vm855_vm14 = vweird.f32 %v1031_v0 }
 0x5c8   :  { %vm856_vm2 = vmor %vm854_vm15, %vm855_vm14 }
 0x5c9   :  { %v850_v2 = vmul.f32 %v1031_v0, %v849_v1 }
 0x5cb   :  { %v851_v3 = vmul.f32 0.5, %v850_v2 }
 0x5cd   :  { %v852_v4 = vsub.f32 1.5, %v851_v3 }
 0x5ce   :  { %s932_s8 = spop %931 }
 0x5cf   :  { %v853_v5 = vmul.f32 %v1031_v0, %v852_v4  ;;  %v845_v9 = vstv %s932_s8 }
 0x5d1   :  { %v857_v6 = vsel %vm856_vm2, %v1031_v0, %v853_v5 }
 0x5d2   :  { %933 = vpush %v857_v6 }
 0x603   :  { %s934_s9 = spop %933 }
 0x604   :  { %v859_v10 = vstv %s934_s9 }
 0x605   :  { %v860_v11 = vsel %vm173_vm0, %v845_v9, %v859_v10 }
 0x606   :  { %v861_v12 = vperm.slane %v860_v11, 0 }
 0x608   :  { %v862_v14 = vmul.f32 %v861_v12, %v1428_v43  ;;  %v863_v15 = vmul.f32 %v861_v12, %v1433_v16 }
 0x60a   :  { %864 = vst.msk [vmem:[#allocation11] sm:$0xff] %vm360_vm1, %v862_v14 }
 0x60b   :  { %865 = vst.msk [vmem:[#allocation11 + $0x8] sm:$0xff] %vm360_vm1, %v863_v15 }
 0x60c   :  { %878 = dma.vmem_to_hbm [thread:$0]  %s871_s11, 256, %s873_s13, [#allocation4], %s1185_s26, %s1185_s26, %s1186_s27  }
 0x60d   :  { %1182 = dma.done.wait [#allocation4], 256  }
 0x60e   :  { %1183 = vsyncadd [#allocation4], 4294967040 }
 0x60f   :  { %883 = vsyncpa [#allocation3], 1 }
 0x610   :  { %884 = vsyncpa [#allocation6], 1 }
 0x611   :  { %885 = vsyncpa [#allocation9], 1 }
 0x612   :  { %886 = vsyncpa [#allocation4], 1 }

</bundles_post_ra>
